<compile_context>
chip_gen: v7x
topology: tpu7x:2x2x1
jax: 0.10.0
libtpu: 0.0.40
codegen_flags: <defaults>
</compile_context>

<pallas_src>
import functools

import jax
import jax.numpy as jnp
import numpy as np
from jax.experimental import pallas as pl
from jax.experimental.pallas import tpu as pltpu


def _hybrid_loss_kernel(x_ref, t_ref, o_ref, *, H, W, smooth):
    # x_ref: (2, H, W) logits (both channels) of the current image
    # t_ref: (H, W)    labels of the current image
    # o_ref: (8, 128)  per-image partials: row0 = ce_sum, row1 = dice_sum, row2 = bce_sum
    x0 = x_ref[0].astype(jnp.float32)
    x1 = x_ref[1].astype(jnp.float32)
    t = t_ref[...].astype(jnp.float32)

    mask1 = (t == 1.0).astype(jnp.float32)   # == target[:, 0] after torch.cat
    mask0 = (t == 0.0).astype(jnp.float32)   # == target[:, 1]

    # --- 2-class softmax via the sigmoid reformulation (1 exp + 1 log / pixel) ---
    d = x1 - x0
    e = jnp.exp(-jnp.abs(d))
    inv = pl.reciprocal(1.0 + e, approx=True)       # EUP vrcp, skips Newton refinement
    p1 = jnp.where(d >= 0.0, inv, e * inv)          # softmax prob of channel 1
    p0 = 1.0 - p1                                   # softmax prob of channel 0
    log1pe = jnp.log(1.0 + e)
    logsm1 = -(jnp.maximum(-d, 0.0) + log1pe)       # log softmax, channel 1
    logsm0 = logsm1 - d                             # log softmax, channel 0

    # --- RobustCrossEntropyLoss(outputs, target[:, 0].long()): label==1 -> ch1 else ch0 ---
    ce_sum = jnp.sum(-(logsm0 + mask1 * d))

    # --- MemoryEfficientSoftDiceLoss (batch_dice=False, do_bg=True, smooth, ddp=False) ---
    # y_onehot = cat(mask1, mask0); channel 0 pairs (p0, mask1), channel 1 pairs (p1, mask0)
    npix = float(H * W)
    inter0 = jnp.sum(p0 * mask1)
    inter1 = jnp.sum(p1 * mask0)
    spred0 = jnp.sum(p0)
    spred1 = npix - spred0                          # p0 + p1 == 1 exactly
    sgt0 = jnp.sum(mask1)
    sgt1 = jnp.sum(mask0)
    dc0 = (2.0 * inter0 + smooth) / jnp.maximum(sgt0 + spred0 + smooth, 1e-8)
    dc1 = (2.0 * inter1 + smooth) / jnp.maximum(sgt1 + spred1 + smooth, 1e-8)
    dice_sum = dc0 + dc1

    # --- EdgeLoss(outputs[:, 1:2], target) ---
    # TODO(synk): the original conv2d(2-channel target, 1-in-channel Sobel kernel) is a
    # channel mismatch in PyTorch (would raise); we apply the Sobel filter to the class-1
    # mask (target[:, 0]) so shapes match the (B,1,H,W) prediction.
    # Separable Sobel-y = vertical diff of the [1,2,1]-smoothed mask, done with XLU rolls.
    # Wrapped rows/cols are zeroed by tiny (1,W)/(H,1) boundary masks (multiplies) to
    # reproduce conv2d's zero padding; no cross-image leakage since each grid step is one
    # image.
    col = jax.lax.broadcasted_iota(jnp.int32, (1, W), 1)
    row = jax.lax.broadcasted_iota(jnp.int32, (H, 1), 0)
    not_first_col = (col > 0).astype(jnp.float32)
    not_last_col = (col < W - 1).astype(jnp.float32)
    not_first_row = (row > 0).astype(jnp.float32)
    not_last_row = (row < H - 1).astype(jnp.float32)

    m_l = pltpu.roll(mask1, 1, axis=1) * not_first_col      # mask1[:, w-1]
    m_r = pltpu.roll(mask1, W - 1, axis=1) * not_last_col   # mask1[:, w+1] (shift W-1 == -1)
    sm = m_l + 2.0 * mask1 + m_r                            # [1,2,1] smoothing
    s_u = pltpu.roll(sm, 1, axis=0) * not_first_row         # sm[h-1, :]
    s_d = pltpu.roll(sm, H - 1, axis=0) * not_last_row      # sm[h+1, :] (shift H-1 == -1)
    conv = s_d - s_u                                        # [-1,0,1]^T diff
    edge = (conv != 0.0).astype(jnp.float32)

    # BCEWithLogits(outputs[:, 1], edge), summed here; mean taken in the wrapper
    bce_sum = jnp.sum(jnp.maximum(x1, 0.0) - x1 * edge
                      + jnp.log(1.0 + jnp.exp(-jnp.abs(x1))))

    # Lane-dense per-image partials: row 0 = ce, row 1 = dice, row 2 = bce.
    rows8 = jax.lax.broadcasted_iota(jnp.int32, (8, 128), 0)
    o_ref[...] = (jnp.where(rows8 == 0, ce_sum, 0.0)
                  + jnp.where(rows8 == 1, dice_sum, 0.0)
                  + jnp.where(rows8 == 2, bce_sum, 0.0))


def hybrid_loss(outputs, target, weight_main=1.0, weight_aux=0.5, smooth=1.0):
    B, C, H, W = outputs.shape
    assert C == 2, "HybridLoss dice path requires 2-channel logits"
    assert target.shape == (B, 1, H, W)
    # W a multiple of 128 and H a multiple of 8 keeps the lane/sublane rolls on the fast
    # aligned path; blocks are full (H, W) planes so BlockSpec constraints always hold.
    # TODO(synk): for very large planes (>= ~1024x1024 on v7x's 64 MiB VMEM) add an
    # H-tiling grid axis with a 1-row halo for the vertical Sobel diff.

    kernel = functools.partial(_hybrid_loss_kernel, H=H, W=W, smooth=float(smooth))

    plane = H * W
    step_in_bytes = plane * (C * outputs.dtype.itemsize + target.dtype.itemsize)
    # double-buffered inputs/outputs + f32 roll/softmax temporaries, clamped to a safe range
    vmem_need = 2 * (step_in_bytes + 8 * 128 * 4) + 8 * plane * 4
    vmem_limit = int(min(max(vmem_need, 32 * 1024 * 1024), 64 * 1024 * 1024))

    partials = pl.pallas_call(
        kernel,
        grid=(B,),
        in_specs=[
            # both logit channels in one contiguous block per image (single DMA)
            pl.BlockSpec((None, C, H, W), lambda b: (b, 0, 0, 0)),
            # target plane of the current image (any numeric dtype; kernel upcasts)
            pl.BlockSpec((None, None, H, W), lambda b: (b, 0, 0, 0)),
        ],
        # per-image (8,128) partial tile; no cross-grid carry, so the batch axis can be
        # sharded across TensorCores (v7x megacore)
        out_specs=pl.BlockSpec((None, 8, 128), lambda b: (b, 0, 0)),
        out_shape=jax.ShapeDtypeStruct((B, 8, 128), jnp.float32),
        compiler_params=pltpu.CompilerParams(
            dimension_semantics=("parallel",),
            vmem_limit_bytes=vmem_limit,
        ),
        cost_estimate=pl.CostEstimate(
            flops=int(60 * B * plane),
            transcendentals=int(4 * B * plane),
            bytes_accessed=int(B * step_in_bytes + B * 8 * 128 * 4),
        ),
    )(outputs, target)

    # Tiny O(B) finalize in plain JAX (keeps the kernel free of a resident accumulator).
    ce_sum = jnp.sum(partials[:, 0, 0])
    dice_sum = jnp.sum(partials[:, 1, 0])
    bce_sum = jnp.sum(partials[:, 2, 0])
    n_all = float(B * H * W)
    ce = ce_sum / n_all
    dice = -(dice_sum / float(B * C))
    main = ce + dice
    aux = (bce_sum / n_all) / 10.0
    total = weight_main * main + weight_aux * aux
    return total, main, aux


def _reference(outputs, target, weight_main=1.0, weight_aux=0.5, smooth=1.0):
    """Pure-JAX reproduction of HybridLoss.forward for verification."""
    B, C, H, W = outputs.shape
    t = target.astype(jnp.float32)
    mask1 = (t == 1.0).astype(jnp.float32)
    mask0 = (t == 0.0).astype(jnp.float32)
    tgt = jnp.concatenate([mask1, mask0], axis=1)                # (B, 2, H, W)
    logits = outputs.astype(jnp.float32)

    logsm = jax.nn.log_softmax(logits, axis=1)
    labels = tgt[:, 0].astype(jnp.int32)
    ce = -jnp.mean(jnp.take_along_axis(logsm, labels[:, None], axis=1))

    probs = jax.nn.softmax(logits, axis=1)
    inter = jnp.sum(probs * tgt, axis=(2, 3))
    spred = jnp.sum(probs, axis=(2, 3))
    sgt = jnp.sum(tgt, axis=(2, 3))
    dc = (2.0 * inter + smooth) / jnp.maximum(sgt + spred + smooth, 1e-8)
    dice = -jnp.mean(dc)
    main = ce + dice

    m = mask1[:, 0]
    pad = jnp.pad(m, ((0, 0), (1, 1), (1, 1)))
    K = jnp.array([[-1., -2., -1.], [0., 0., 0.], [1., 2., 1.]], jnp.float32)
    conv = sum(K[i, j] * pad[:, i:i + H, j:j + W] for i in range(3) for j in range(3))
    edge = (jnp.abs(conv) > 0.0).astype(jnp.float32)
    logit = logits[:, 1]
    bce = jnp.mean(jnp.maximum(logit, 0.0) - logit * edge
                   + jnp.log(1.0 + jnp.exp(-jnp.abs(logit))))
    aux = bce / 10.0
    total = weight_main * main + weight_aux * aux
    return total, main, aux


if __name__ == "__main__":
    key = jax.random.PRNGKey(0)
    k1, k2 = jax.random.split(key)
    B, C, H, W = 2, 2, 16, 128
    outputs = jax.random.normal(k1, (B, C, H, W), dtype=jnp.float32)
    # int8 labels: the kernel upcasts in VMEM; narrower target cuts HBM bytes/pixel.
    target = jax.random.randint(k2, (B, 1, H, W), 0, 2).astype(jnp.int8)

    total, main, aux = hybrid_loss(outputs, target, weight_main=1.0, weight_aux=0.5)
    total = jax.block_until_ready(total)
    main = jax.block_until_ready(main)
    aux = jax.block_until_ready(aux)

    ref_total, ref_main, ref_aux = _reference(outputs, target, 1.0, 0.5)
    # slightly relaxed tolerance: the dice term uses the EUP approximate reciprocal
    np.testing.assert_allclose(np.asarray(total), np.asarray(ref_total), rtol=5e-4, atol=5e-4)
    np.testing.assert_allclose(np.asarray(main), np.asarray(ref_main), rtol=5e-4, atol=5e-4)
    np.testing.assert_allclose(np.asarray(aux), np.asarray(ref_aux), rtol=5e-4, atol=5e-4)

    print("KERNEL_OK")
</pallas_src>

<mosaic_0001>
module attributes {stable_mosaic.version = 11 : i64} {
  func.func @_hybrid_loss_kernel(%arg0: i32, %arg1: memref<1x2x16x128xf32, #tpu.memory_space<vmem>>, %arg2: memref<1x1x16x128xi8, #tpu.memory_space<vmem>>, %arg3: memref<1x8x128xf32, #tpu.memory_space<vmem>>) attributes {dimension_semantics = [#tpu.dimension_semantics<parallel>], iteration_bounds = array<i64: 2>, scalar_prefetch = 0 : i64, scratch_operands = 0 : i64, tpu.core_type = #tpu.core_type<tc>, window_params = [{transform_indices = @transform_0, window_bounds = array<i64: 1, 2, 16, 128>}, {transform_indices = @transform_1, window_bounds = array<i64: 1, 1, 16, 128>}, {transform_indices = @transform_2, window_bounds = array<i64: 1, 8, 128>}]} {
    %c0 = arith.constant 0 : index
    %c0_0 = arith.constant 0 : index
    %c0_1 = arith.constant 0 : index
    %c0_2 = arith.constant 0 : index
    %0 = vector.load %arg1[%c0, %c0_0, %c0_1, %c0_2] : memref<1x2x16x128xf32, #tpu.memory_space<vmem>>, vector<1x1x16x128xf32>
    %1 = vector.shape_cast %0 : vector<1x1x16x128xf32> to vector<16x128xf32>
    %c0_3 = arith.constant 0 : index
    %c1 = arith.constant 1 : index
    %c0_4 = arith.constant 0 : index
    %c0_5 = arith.constant 0 : index
    %2 = vector.load %arg1[%c0_3, %c1, %c0_4, %c0_5] : memref<1x2x16x128xf32, #tpu.memory_space<vmem>>, vector<1x1x16x128xf32>
    %3 = vector.shape_cast %2 : vector<1x1x16x128xf32> to vector<16x128xf32>
    %c0_6 = arith.constant 0 : index
    %c0_7 = arith.constant 0 : index
    %c0_8 = arith.constant 0 : index
    %c0_9 = arith.constant 0 : index
    %4 = vector.load %arg2[%c0_6, %c0_7, %c0_8, %c0_9] : memref<1x1x16x128xi8, #tpu.memory_space<vmem>>, vector<1x1x16x128xi8>
    %5 = vector.shape_cast %4 : vector<1x1x16x128xi8> to vector<16x128xi8>
    %6 = arith.sitofp %5 : vector<16x128xi8> to vector<16x128xf32>
    %cst = arith.constant 1.000000e+00 : f32
    %7 = vector.broadcast %cst : f32 to vector<16x128xf32>
    %8 = arith.cmpf oeq, %6, %7 : vector<16x128xf32>
    %9 = arith.extui %8 : vector<16x128xi1> to vector<16x128xi32>
    %10 = arith.sitofp %9 : vector<16x128xi32> to vector<16x128xf32>
    %cst_10 = arith.constant 0.000000e+00 : f32
    %11 = vector.broadcast %cst_10 : f32 to vector<16x128xf32>
    %12 = arith.cmpf oeq, %6, %11 : vector<16x128xf32>
    %13 = arith.extui %12 : vector<16x128xi1> to vector<16x128xi32>
    %14 = arith.sitofp %13 : vector<16x128xi32> to vector<16x128xf32>
    %15 = arith.subf %3, %1 : vector<16x128xf32>
    %16 = math.absf %15 : vector<16x128xf32>
    %cst_11 = arith.constant 0.000000e+00 : f32
    %17 = vector.broadcast %cst_11 : f32 to vector<16x128xf32>
    %18 = arith.subf %17, %16 : vector<16x128xf32>
    %19 = math.exp %18 : vector<16x128xf32>
    %cst_12 = arith.constant 1.000000e+00 : f32
    %20 = vector.broadcast %cst_12 : f32 to vector<16x128xf32>
    %21 = arith.addf %20, %19 : vector<16x128xf32>
    %22 = tpu.reciprocal %21 {approx = true} : vector<16x128xf32> -> vector<16x128xf32>
    %cst_13 = arith.constant 0.000000e+00 : f32
    %23 = vector.broadcast %cst_13 : f32 to vector<16x128xf32>
    %24 = arith.cmpf oge, %15, %23 : vector<16x128xf32>
    %25 = arith.mulf %19, %22 : vector<16x128xf32>
    %26 = arith.select %24, %22, %25 : vector<16x128xi1>, vector<16x128xf32>
    %cst_14 = arith.constant 1.000000e+00 : f32
    %27 = vector.broadcast %cst_14 : f32 to vector<16x128xf32>
    %28 = arith.subf %27, %26 : vector<16x128xf32>
    %cst_15 = arith.constant 1.000000e+00 : f32
    %29 = vector.broadcast %cst_15 : f32 to vector<16x128xf32>
    %30 = arith.addf %29, %19 : vector<16x128xf32>
    %31 = math.log %30 : vector<16x128xf32>
    %cst_16 = arith.constant 0.000000e+00 : f32
    %32 = vector.broadcast %cst_16 : f32 to vector<16x128xf32>
    %33 = arith.subf %32, %15 : vector<16x128xf32>
    %cst_17 = arith.constant 0.000000e+00 : f32
    %34 = vector.broadcast %cst_17 : f32 to vector<16x128xf32>
    %35 = arith.maximumf %33, %34 : vector<16x128xf32>
    %36 = arith.addf %35, %31 : vector<16x128xf32>
    %cst_18 = arith.constant 0.000000e+00 : f32
    %37 = vector.broadcast %cst_18 : f32 to vector<16x128xf32>
    %38 = arith.subf %37, %36 : vector<16x128xf32>
    %39 = arith.subf %38, %15 : vector<16x128xf32>
    %40 = arith.mulf %10, %15 : vector<16x128xf32>
    %41 = arith.addf %39, %40 : vector<16x128xf32>
    %cst_19 = arith.constant 0.000000e+00 : f32
    %42 = vector.broadcast %cst_19 : f32 to vector<16x128xf32>
    %43 = arith.subf %42, %41 : vector<16x128xf32>
    %44 = vector.shape_cast %43 : vector<16x128xf32> to vector<1x16x128xf32>
    %cst_20 = arith.constant dense<0.000000e+00> : vector<1xf32>
    %45 = vector.multi_reduction <add>, %44, %cst_20 [1, 2] : vector<1x16x128xf32> to vector<1xf32>
    %46 = vector.shape_cast %45 : vector<1xf32> to vector<1x1x1xf32>
    %47 = vector.extract %46[0, 0, 0] : f32 from vector<1x1x1xf32>
    %48 = arith.mulf %28, %10 : vector<16x128xf32>
    %49 = vector.shape_cast %48 : vector<16x128xf32> to vector<1x16x128xf32>
    %cst_21 = arith.constant dense<0.000000e+00> : vector<1xf32>
    %50 = vector.multi_reduction <add>, %49, %cst_21 [1, 2] : vector<1x16x128xf32> to vector<1xf32>
    %51 = vector.shape_cast %50 : vector<1xf32> to vector<1x1x1xf32>
    %52 = vector.extract %51[0, 0, 0] : f32 from vector<1x1x1xf32>
    %53 = arith.mulf %26, %14 : vector<16x128xf32>
    %54 = vector.shape_cast %53 : vector<16x128xf32> to vector<1x16x128xf32>
    %cst_22 = arith.constant dense<0.000000e+00> : vector<1xf32>
    %55 = vector.multi_reduction <add>, %54, %cst_22 [1, 2] : vector<1x16x128xf32> to vector<1xf32>
    %56 = vector.shape_cast %55 : vector<1xf32> to vector<1x1x1xf32>
    %57 = vector.extract %56[0, 0, 0] : f32 from vector<1x1x1xf32>
    %58 = vector.shape_cast %28 : vector<16x128xf32> to vector<1x16x128xf32>
    %cst_23 = arith.constant dense<0.000000e+00> : vector<1xf32>
    %59 = vector.multi_reduction <add>, %58, %cst_23 [1, 2] : vector<1x16x128xf32> to vector<1xf32>
    %60 = vector.shape_cast %59 : vector<1xf32> to vector<1x1x1xf32>
    %61 = vector.extract %60[0, 0, 0] : f32 from vector<1x1x1xf32>
    %cst_24 = arith.constant 2.048000e+03 : f32
    %62 = arith.subf %cst_24, %61 : f32
    %63 = vector.shape_cast %10 : vector<16x128xf32> to vector<1x16x128xf32>
    %cst_25 = arith.constant dense<0.000000e+00> : vector<1xf32>
    %64 = vector.multi_reduction <add>, %63, %cst_25 [1, 2] : vector<1x16x128xf32> to vector<1xf32>
    %65 = vector.shape_cast %64 : vector<1xf32> to vector<1x1x1xf32>
    %66 = vector.extract %65[0, 0, 0] : f32 from vector<1x1x1xf32>
    %67 = vector.shape_cast %14 : vector<16x128xf32> to vector<1x16x128xf32>
    %cst_26 = arith.constant dense<0.000000e+00> : vector<1xf32>
    %68 = vector.multi_reduction <add>, %67, %cst_26 [1, 2] : vector<1x16x128xf32> to vector<1xf32>
    %69 = vector.shape_cast %68 : vector<1xf32> to vector<1x1x1xf32>
    %70 = vector.extract %69[0, 0, 0] : f32 from vector<1x1x1xf32>
    %cst_27 = arith.constant 2.000000e+00 : f32
    %71 = arith.mulf %cst_27, %52 : f32
    %cst_28 = arith.constant 1.000000e+00 : f32
    %72 = arith.addf %71, %cst_28 : f32
    %73 = arith.addf %66, %61 : f32
    %cst_29 = arith.constant 1.000000e+00 : f32
    %74 = arith.addf %73, %cst_29 : f32
    %cst_30 = arith.constant 9.99999993E-9 : f32
    %75 = arith.maximumf %74, %cst_30 : f32
    %76 = arith.divf %72, %75 : f32
    %cst_31 = arith.constant 2.000000e+00 : f32
    %77 = arith.mulf %cst_31, %57 : f32
    %cst_32 = arith.constant 1.000000e+00 : f32
    %78 = arith.addf %77, %cst_32 : f32
    %79 = arith.addf %70, %62 : f32
    %cst_33 = arith.constant 1.000000e+00 : f32
    %80 = arith.addf %79, %cst_33 : f32
    %cst_34 = arith.constant 9.99999993E-9 : f32
    %81 = arith.maximumf %80, %cst_34 : f32
    %82 = arith.divf %78, %81 : f32
    %83 = arith.addf %76, %82 : f32
    %84 = tpu.iota {dimensions = array<i32: 1>} : vector<1x128xi32>
    %85 = tpu.iota {dimensions = array<i32: 0>} : vector<16x1xi32>
    %c0_i32 = arith.constant 0 : i32
    %86 = vector.broadcast %c0_i32 : i32 to vector<1x128xi32>
    %87 = arith.cmpi sgt, %84, %86 : vector<1x128xi32>
    %88 = arith.extui %87 : vector<1x128xi1> to vector<1x128xi32>
    %89 = arith.sitofp %88 : vector<1x128xi32> to vector<1x128xf32>
    %c127_i32 = arith.constant 127 : i32
    %90 = vector.broadcast %c127_i32 : i32 to vector<1x128xi32>
    %91 = arith.cmpi slt, %84, %90 : vector<1x128xi32>
    %92 = arith.extui %91 : vector<1x128xi1> to vector<1x128xi32>
    %93 = arith.sitofp %92 : vector<1x128xi32> to vector<1x128xf32>
    %c0_i32_35 = arith.constant 0 : i32
    %94 = vector.broadcast %c0_i32_35 : i32 to vector<16x1xi32>
    %95 = arith.cmpi sgt, %85, %94 : vector<16x1xi32>
    %96 = arith.extui %95 : vector<16x1xi1> to vector<16x1xi32>
    %97 = arith.sitofp %96 : vector<16x1xi32> to vector<16x1xf32>
    %c15_i32 = arith.constant 15 : i32
    %98 = vector.broadcast %c15_i32 : i32 to vector<16x1xi32>
    %99 = arith.cmpi slt, %85, %98 : vector<16x1xi32>
    %100 = arith.extui %99 : vector<16x1xi1> to vector<16x1xi32>
    %101 = arith.sitofp %100 : vector<16x1xi32> to vector<16x1xf32>
    %c1_i32 = arith.constant 1 : i32
    %102 = tpu.dynamic_rotate %10 by %c1_i32 dim 1 : vector<16x128xf32>, i32 -> vector<16x128xf32>
    %103 = vector.broadcast %89 : vector<1x128xf32> to vector<16x128xf32>
    %104 = arith.mulf %102, %103 : vector<16x128xf32>
    %c127_i32_36 = arith.constant 127 : i32
    %105 = tpu.dynamic_rotate %10 by %c127_i32_36 dim 1 : vector<16x128xf32>, i32 -> vector<16x128xf32>
    %106 = vector.broadcast %93 : vector<1x128xf32> to vector<16x128xf32>
    %107 = arith.mulf %105, %106 : vector<16x128xf32>
    %cst_37 = arith.constant 2.000000e+00 : f32
    %108 = vector.broadcast %cst_37 : f32 to vector<16x128xf32>
    %109 = arith.mulf %108, %10 : vector<16x128xf32>
    %110 = arith.addf %104, %109 : vector<16x128xf32>
    %111 = arith.addf %110, %107 : vector<16x128xf32>
    %c1_i32_38 = arith.constant 1 : i32
    %112 = tpu.dynamic_rotate %111 by %c1_i32_38 dim 0 : vector<16x128xf32>, i32 -> vector<16x128xf32>
    %113 = vector.broadcast %97 : vector<16x1xf32> to vector<16x128xf32>
    %114 = arith.mulf %112, %113 : vector<16x128xf32>
    %c15_i32_39 = arith.constant 15 : i32
    %115 = tpu.dynamic_rotate %111 by %c15_i32_39 dim 0 : vector<16x128xf32>, i32 -> vector<16x128xf32>
    %116 = vector.broadcast %101 : vector<16x1xf32> to vector<16x128xf32>
    %117 = arith.mulf %115, %116 : vector<16x128xf32>
    %118 = arith.subf %117, %114 : vector<16x128xf32>
    %cst_40 = arith.constant 0.000000e+00 : f32
    %119 = vector.broadcast %cst_40 : f32 to vector<16x128xf32>
    %120 = arith.cmpf one, %118, %119 : vector<16x128xf32>
    %121 = arith.extui %120 : vector<16x128xi1> to vector<16x128xi32>
    %122 = arith.sitofp %121 : vector<16x128xi32> to vector<16x128xf32>
    %cst_41 = arith.constant 0.000000e+00 : f32
    %123 = vector.broadcast %cst_41 : f32 to vector<16x128xf32>
    %124 = arith.maximumf %3, %123 : vector<16x128xf32>
    %125 = arith.mulf %3, %122 : vector<16x128xf32>
    %126 = arith.subf %124, %125 : vector<16x128xf32>
    %127 = math.absf %3 : vector<16x128xf32>
    %cst_42 = arith.constant 0.000000e+00 : f32
    %128 = vector.broadcast %cst_42 : f32 to vector<16x128xf32>
    %129 = arith.subf %128, %127 : vector<16x128xf32>
    %130 = math.exp %129 : vector<16x128xf32>
    %cst_43 = arith.constant 1.000000e+00 : f32
    %131 = vector.broadcast %cst_43 : f32 to vector<16x128xf32>
    %132 = arith.addf %131, %130 : vector<16x128xf32>
    %133 = math.log %132 : vector<16x128xf32>
    %134 = arith.addf %126, %133 : vector<16x128xf32>
    %135 = vector.shape_cast %134 : vector<16x128xf32> to vector<1x16x128xf32>
    %cst_44 = arith.constant dense<0.000000e+00> : vector<1xf32>
    %136 = vector.multi_reduction <add>, %135, %cst_44 [1, 2] : vector<1x16x128xf32> to vector<1xf32>
    %137 = vector.shape_cast %136 : vector<1xf32> to vector<1x1x1xf32>
    %138 = vector.extract %137[0, 0, 0] : f32 from vector<1x1x1xf32>
    %139 = tpu.iota {dimensions = array<i32: 0>} : vector<8x128xi32>
    %c0_i32_45 = arith.constant 0 : i32
    %140 = vector.broadcast %c0_i32_45 : i32 to vector<8x128xi32>
    %141 = arith.cmpi eq, %139, %140 : vector<8x128xi32>
    %cst_46 = arith.constant 0.000000e+00 : f32
    %142 = vector.broadcast %47 : f32 to vector<8x128xf32>
    %143 = vector.broadcast %cst_46 : f32 to vector<8x128xf32>
    %144 = arith.select %141, %142, %143 : vector<8x128xi1>, vector<8x128xf32>
    %c1_i32_47 = arith.constant 1 : i32
    %145 = vector.broadcast %c1_i32_47 : i32 to vector<8x128xi32>
    %146 = arith.cmpi eq, %139, %145 : vector<8x128xi32>
    %cst_48 = arith.constant 0.000000e+00 : f32
    %147 = vector.broadcast %83 : f32 to vector<8x128xf32>
    %148 = vector.broadcast %cst_48 : f32 to vector<8x128xf32>
    %149 = arith.select %146, %147, %148 : vector<8x128xi1>, vector<8x128xf32>
    %150 = arith.addf %144, %149 : vector<8x128xf32>
    %c2_i32 = arith.constant 2 : i32
    %151 = vector.broadcast %c2_i32 : i32 to vector<8x128xi32>
    %152 = arith.cmpi eq, %139, %151 : vector<8x128xi32>
    %cst_49 = arith.constant 0.000000e+00 : f32
    %153 = vector.broadcast %138 : f32 to vector<8x128xf32>
    %154 = vector.broadcast %cst_49 : f32 to vector<8x128xf32>
    %155 = arith.select %152, %153, %154 : vector<8x128xi1>, vector<8x128xf32>
    %156 = arith.addf %150, %155 : vector<8x128xf32>
    %c0_50 = arith.constant 0 : index
    %c0_51 = arith.constant 0 : index
    %c0_52 = arith.constant 0 : index
    %157 = vector.load %arg3[%c0_50, %c0_51, %c0_52] : memref<1x8x128xf32, #tpu.memory_space<vmem>>, vector<1x8x128xf32>
    %158 = vector.shape_cast %157 : vector<1x8x128xf32> to vector<8x128xf32>
    %159 = vector.shape_cast %156 : vector<8x128xf32> to vector<1x8x128xf32>
    tpu.vector_store %arg3[%c0_50, %c0_51, %c0_52], %159 {strides = array<i32>} : memref<1x8x128xf32, #tpu.memory_space<vmem>>, vector<1x8x128xf32>,
    return
  }
  func.func @transform_0(%arg0: i32) -> (i32, i32, i32, i32) {
    %c0_i32 = arith.constant 0 : i32
    %c0_i32_0 = arith.constant 0 : i32
    %c0_i32_1 = arith.constant 0 : i32
    %c0_i32_2 = arith.constant 0 : i32
    return %arg0, %c0_i32, %c0_i32_0, %c0_i32_1 : i32, i32, i32, i32
  }
  func.func @transform_1(%arg0: i32) -> (i32, i32, i32, i32) {
    %c0_i32 = arith.constant 0 : i32
    %c0_i32_0 = arith.constant 0 : i32
    %c0_i32_1 = arith.constant 0 : i32
    %c0_i32_2 = arith.constant 0 : i32
    return %arg0, %c0_i32, %c0_i32_0, %c0_i32_1 : i32, i32, i32, i32
  }
  func.func @transform_2(%arg0: i32) -> (i32, i32, i32) {
    %c0_i32 = arith.constant 0 : i32
    %c0_i32_0 = arith.constant 0 : i32
    %c0_i32_1 = arith.constant 0 : i32
    return %arg0, %c0_i32, %c0_i32_0 : i32, i32, i32
  }
}

</mosaic_0001>

<bundles_post_ra>
// kernel: tpu_custom_call.1
= control target key start
LH: loop header
LB: loop body
LE: loop exit
PB: predicated region body
PF: predicated region fallthrough
CT: control target
= control target key end

     0   :  { %7 = vsyncpa [#allocation3], 0  ;;  %s1148_s0 = inlined_call_operand.hbm [shape: f32[2,2,16,128], index: 0, kind: input, shape index: {}]   ;;  %s1149_s1 = inlined_call_operand.hbm [shape: s8[2,1,16,128], index: 1, kind: input, shape index: {}]   ;;  %s1150_s2 = inlined_call_operand.hbm [shape: f32[2,8,128], index: 2, kind: output, shape index: {}]  }
   0x1   :  { %9 = vsyncpa [#allocation3 + $0x1], 0 }
   0x2   :  { %10 = vsyncpa [#allocation6], 0 }
   0x3   :  { %12 = vsyncpa [#allocation6 + $0x1], 0 }
   0x4   :  { %13 = vsyncpa [#allocation4], 0 }
   0x5   :  { %15 = vsyncpa [#allocation4 + $0x1], 0  ;;  %s869_s9 = smov 0   ;;  %s871_s10 = smov 0  }
   0x6   :  { %s873_s11 = smov 0   ;;  %s875_s12 = smov 0  }
   0x7 LB: > { %s890_s13 = sadd.s32 4294967295, %s841_s12   ;;  %s565_s14 = sadd.s32 4294967294, %s841_s12   ;;  %s841_s12 = sphi %s875_s12, %s1166_s12   ;;  %s837_s11 = sphi %s873_s11, %s1165_s11   ;;  %s833_s10 = sphi %s871_s10, %s1164_s10   ;;  %s829_s9 = sphi %s869_s9, %s1163_s9  }
   0x8   : > { %s894_s15 = sadd.s32 1, %s841_s12   ;;  %s28_s16 = sadd.s32 1, %s837_s11 }
   0x9   : > { %s25_s17 = ssub.s32 %s841_s12, %s894_s15  ;;  %p35_p0 = scmp.ne.s32.totalorder %s837_s11, %s833_s10 }
   0xa   : > { %p26_p1 = scmp.eq.s32.totalorder %s25_s17, 0  ;;  %p36_p2 = scmp.eq.s32.totalorder %s841_s12, 0 }
   0xb   : > { %p41_p3 = scmp.ne.s32.totalorder %s833_s10, %s829_s9  ;;  %p42_p4 = scmp.eq.s32.totalorder %s890_s13, 0 }
   0xc   : > { %s906_s18 = scalar_select %p26_p1, %s837_s11, %s28_s16  }
   0xd   : > { %p908_p5 = por %p36_p2, %p35_p0  ;;  %p912_p6 = por %p42_p4, %p41_p3 }
   0xe   : > { %p91_p7 = scmp.eq.s32.totalorder %s890_s13, 1  ;;  %p97_p8 = scmp.eq.s32.totalorder %s565_s14, 1 }
   0xf   : > { %s1154_s20 = scalar_select %p912_p6, 1, 0 }
  0x10   : > { %p635_p10 = scmp.lt.s32.totalorder %s841_s12, 2  ;;  %p919_p11 = por %p91_p7, %p35_p0 }
  0x11   : > { %p923_p12 = por %p97_p8, %p41_p3  ;;  %s928_s23 = sand.u32 1, %s837_s11  }
  0x12   : > { %s1155_s21 = scalar_select %p919_p11, 1, 0 }
  0x13   : > { %s1156_s22 = scalar_select %p923_p12, 1, 0 }
  0x14   : > { %s594_s24 = sshll.u32 %s841_s12, 9  ;;  %s568_s25 = sshll.u32 %s928_s23, 5 }
  0x15   : > { %s935_s28 = scalar_lea.hbm %s1148_s0, %s594_s24  ;;  %s121_s29 = scalar_lea.vmem [#allocation2], %s568_s25 }
  0x16   : > { %s128_s30 = sshll.u32 %s121_s29, 4  ;;  %p939_p13 = pnand %p635_p10, %p908_p5  ;;  %s943_s30 = int_to_ptr.vmem [resolvable:$true] %s128_s30 }
  0x17   : > { %s118_s4 = scalar_lea.sflag [#allocation3], %s928_s23  ;;  %s711_s5 = scalar_lea.hbm %s935_s28, 512 }
  0x18   : > { %p712_p0 = scmp.ne.s32.totalorder %s935_s28, %s711_s5  ;;  %p713_p1 = pneg %p939_p13 }
  0x19   : > { %s716_s8 = scalar_lea.hbm %s1148_s0, 1024  ;;  %p717_p4 = scmp.lt.u32.totalorder %s935_s28, %s1148_s0 }
  0x1a   : > { %p714_p2 = pnand %p713_p1, %p712_p0  ;;  %p718_p5 = scmp.lt.u32.totalorder %s716_s8, %s711_s5 }
  0x1b   : > { %p720_p8 = scmp.lt.u32.totalorder %s711_s5, %s935_s28 }
  0x1c   : > { %p715_p3 = pneg %p714_p2  ;;  %p719_p7 = por %p718_p5, %p717_p4 }
  0x1e   : > { %p721_p10 = por %p720_p8, %p719_p7 }
  0x20   : > { %p722_p9 = pnand %p721_p10, %p715_p3 }
  0x22   : > { %725 = shalt.err (!%p722_p9)
}
  0x23   : > { %s726_s17 = scalar_lea.vmem %s943_s30, 512  ;;  %s843_s19 = smov [#allocation2]  }
  0x24   : > { %p727_p0 = scmp.ne.s32.totalorder %s943_s30, %s726_s17  ;;  %s731_s24 = sshll.u32 %s843_s19, 4  ;;  %s732_s24 = int_to_ptr.vmem [resolvable:$false] %s731_s24 }
  0x25   : > { %s733_s25 = scalar_lea.vmem %s732_s24, 1024  ;;  %p734_p11 = scmp.lt.s32.totalorder %s943_s30, %s732_s24 }
  0x26   : > { %p729_p2 = pnand %p727_p0, %p713_p1  ;;  %p735_p4 = scmp.lt.s32.totalorder %s733_s25, %s726_s17 }
  0x28   : > { %p730_p12 = pneg %p729_p2  ;;  %p736_p5 = por %p735_p4, %p734_p11 }
  0x2a   : > { %p737_p7 = pnand %p736_p5, %p730_p12 }
  0x2c   : > { %740 = shalt.err (!%p737_p7)
}
  0x2d   : > { %s844_s26 = smov 128   ;;  %s845_s27 = smov 8  }
  0x2e   : > { %627 = dma.hbm_to_vmem [thread:$0]  (!%p939_p13), %s935_s28, 512, %s943_s30, %s118_s4, %s844_s26, %s844_s26, %s845_s27  }
  0x2f   : > { %p574_p9 = scmp.ge.s32.totalorder %s841_s12, 1  ;;  %p157_p3 = scmp.lt.s32.totalorder %s841_s12, 3 }
  0x30   : > { %s571_s29 = sshll.u32 %s928_s23, 2  ;;  %s595_s6 = sshll.u32 %s841_s12, 6 }
  0x31   : > { %p976_p11 = pnand %p574_p9, %p157_p3  ;;  %s142_s7 = scalar_lea.vmem [#allocation5], %s571_s29 }
  0x32   : > { %s149_s8 = sshll.u32 %s142_s7, 4  ;;  %s984_s17 = scalar_lea.hbm %s1149_s1, %s595_s6  ;;  %s986_s8 = int_to_ptr.vmem [resolvable:$true] %s149_s8 }
  0x33   : > { %s139_s28 = scalar_lea.sflag [#allocation6], %s928_s23  ;;  %s741_s30 = scalar_lea.hbm %s984_s17, 64 }
  0x34   : > { %p742_p12 = scmp.ne.s32.totalorder %s984_s17, %s741_s30  ;;  %s746_s24 = scalar_lea.hbm %s1149_s1, 128 }
  0x35   : > { %p747_p0 = scmp.lt.u32.totalorder %s984_s17, %s1149_s1  ;;  %p748_p2 = scmp.lt.u32.totalorder %s746_s24, %s741_s30 }
  0x36   : > { %p744_p8 = pnand %p742_p12, %p713_p1  ;;  %p750_p5 = scmp.lt.u32.totalorder %s741_s30, %s984_s17 }
  0x37   : > { %p749_p4 = por %p748_p2, %p747_p0 }
  0x38   : > { %p745_p10 = pneg %p744_p8 }
  0x39   : > { %p751_p7 = por %p750_p5, %p749_p4 }
  0x3b   : > { %p752_p9 = pnand %p751_p7, %p745_p10 }
  0x3d   : > { %755 = shalt.err (!%p752_p9)
}
  0x3e   : > { %s756_s27 = scalar_lea.vmem %s986_s8, 64  ;;  %s846_s29 = smov [#allocation5]  }
  0x3f   : > { %p757_p3 = scmp.ne.s32.totalorder %s986_s8, %s756_s27  ;;  %s761_s6 = sshll.u32 %s846_s29, 4  ;;  %s762_s6 = int_to_ptr.vmem [resolvable:$false] %s761_s6 }
  0x40   : > { %s763_s7 = scalar_lea.vmem %s762_s6, 128  ;;  %p764_p6 = scmp.lt.s32.totalorder %s986_s8, %s762_s6 }
  0x41   : > { %p759_p12 = pnand %p757_p3, %p713_p1  ;;  %p765_p0 = scmp.lt.s32.totalorder %s763_s7, %s756_s27 }
  0x43   : > { %p760_p8 = pneg %p759_p12  ;;  %p766_p2 = por %p765_p0, %p764_p6 }
  0x45   : > { %p767_p4 = pnand %p766_p2, %p760_p8 }
  0x47   : > { %770 = shalt.err (!%p767_p4)
}
  0x48   : > { %s847_s14 = smov 32   ;;  %s848_s16 = smov 2  }
  0x49   : > { %630 = dma.hbm_to_vmem [thread:$0]  (!%p939_p13), %s984_s17, 64, %s986_s8, %s139_s28, %s847_s14, %s847_s14, %s848_s16  }
  0x4a   : > { %161 = sbr.rel (%p976_p11) target bundleno = 458 (0x1ca), region = 28  ;;  %s1017_s30 = sand.u32 (!%p976_p11), 1, %s833_s10  }
  0x4b   : > { %s575_s4 = sshll.u32 (!%p976_p11), %s1017_s30, 5  ;;  %s164_s19 = scalar_lea.sflag (!%p976_p11), [#allocation3], %s1017_s30 }
  0x4c   : > { %s167_s24 = scalar_lea.vmem (!%p976_p11), [#allocation2], %s575_s4  ;;  %p1159_p6 = scmp.ne.s32.totalorder (!%p976_p11), %s1154_s20, 0 }
  0x51   : > { %816 = dma.done.wait (%p1159_p6), %s164_s19, 512  }
  0x52   : > { %818 = vsyncadd (%p1159_p6), %s164_s19, 4294966784  ;;  %s576_s23 = sshll.u32 %s1017_s30, 2  ;;  %s173_s3 = scalar_lea.sflag [#allocation6], %s1017_s30 }
  0x53   : > { %s176_s5 = scalar_lea.vmem [#allocation5], %s576_s23 }
  0x54   : > { %820 = dma.done.wait (%p1159_p6), %s173_s3, 64  }
  0x55   : > { %822 = vsyncadd (%p1159_p6), %s173_s3, 4294967232  ;;  %v597_v0 = vld [vmem:[%s176_s5] sm:$0xf]   ;;  %v203_v2 = vld [vmem:[%s167_s24 + $0x8] sm:$0xff]  ;;  %v849_v13 = vmov 0.0   ;;  %s850_s20 = smov 1  }
  0x56   : > { %v202_v1 = vld [vmem:[%s167_s24] sm:$0xff]  ;;  %v598_v3 = vunpack.c.0.s8 %v597_v0  ;;  %v599_v4 = vunpack.c.1.s8 %v597_v0  ;;  %v1031_v5 = vld [vmem:[%s167_s24 + $0x10] sm:$0xff]  ;;  %v1033_v6 = vld [vmem:[%s167_s24 + $0x18] sm:$0xff]  ;;  %s851_s8 = smov 127   ;;  %s852_s19 = smov 1e-08  }
  0x57   : > { %v1036_v7 = vsub.f32 %v1031_v5, %v202_v1  ;;  %v1039_v8 = vsub.f32 %v1033_v6, %v203_v2  ;;  %v420_v1 = vand.u32 2147483647, %v1031_v5  ;;  %v421_v2 = vand.u32 2147483647, %v1033_v6  ;;  %p1160_p1 = scmp.ne.s32.totalorder %s1155_s21, 0 }
  0x58   : > { %v211_v9 = vcvt.s32.f32 %v598_v3  ;;  %v212_v10 = vcvt.s32.f32 %v599_v4 }
  0x59   : > { %v227_v11 = vand.u32 2147483647, %v1036_v7  ;;  %v228_v12 = vand.u32 2147483647, %v1039_v8  ;;  %v251_v26 = vsub.f32 0.0, %v1036_v7  ;;  %v252_v27 = vsub.f32 0.0, %v1039_v8 }
  0x5a   : > { %vm213_vm0 = vcmp.eq.f32.partialorder %v211_v9, 1.0  ;;  %vm214_vm1 = vcmp.eq.f32.partialorder %v212_v10, 1.0  ;;  %vm219_vm2 = vcmp.eq.f32.partialorder %v211_v9, 0.0  ;;  %vm220_vm3 = vcmp.eq.f32.partialorder %v212_v10, 0.0 }
  0x5b   : > { %v1044_v14 = vsel %vm213_vm0, 1.0, %v849_v13  ;;  %v1047_v15 = vsel %vm214_vm1, 1.0, %v849_v13  ;;  %v229_v16 = vsub.f32 0.0, %v227_v11  ;;  %v230_v17 = vsub.f32 0.0, %v228_v12 }
  0x5c   : > { %v677_v18 = vpack.i.bf16 %v1047_v15, %v1044_v14  ;;  %v312_v19 = vadd.f32 %v1047_v15, %v1044_v14  ;;  %vm239_vm4 = vcmp.ge.f32.partialorder %v1036_v7, 0.0  ;;  %vm240_vm5 = vcmp.ge.f32.partialorder %v1039_v8, 0.0 }
  0x5d   : > { %v231_v20 = vmul.f32 1.442695, %v229_v16  ;;  %v233_v21 = vmul.f32 1.442695, %v230_v17  ;;  %v582_v31 = vsel %vm219_vm2, 1.0, %v849_v13  ;;  %v253_v32 = vmax.f32 %v251_v26, 0.0 }
  0x5e   : > { %678 = vrot.lane.b32.xlu0 %v677_v18, %s850_s20  ;;  %313 = vadd.xlane.f32.xlu1 %v312_v19  ;;  %v583_v35 = vsel %vm220_vm3, 1.0, %v849_v13  ;;  %v254_v36 = vmax.f32 %v252_v27, 0.0  ;;  %v261_v49 = vmul.f32 %v1044_v14, %v1036_v7  ;;  %v262_v55 = vmul.f32 %v1047_v15, %v1039_v8 }
  0x5f   : > { %687 = vpow2.f32 %v231_v20  ;;  %v322_v0 = vadd.f32 %v583_v35, %v582_v31  ;;  %v422_v3 = vsub.f32 0.0, %v420_v1  ;;  %v423_v4 = vsub.f32 0.0, %v421_v2 }
  0x60   : > { %689 = vpow2.f32 %v233_v21  ;;  %v386_v27 = vmul.f32 2.0, %v1044_v14 }
  0x61   : > { %v424_v9 = vmul.f32 1.442695, %v422_v3 }
  0x62   : > { %683 = vrot.lane.b32.xlu0 %v677_v18, %s851_s8 }
  0x69   : > { %v688_v22 = vpop.eup %687 }
  0x6a   : > { %v690_v23 = vpop.eup %689  ;;  %v235_v24 = vadd.f32 1.0, %v688_v22 }
  0x6b   : > { %v236_v25 = vadd.f32 1.0, %v690_v23 }
  0x6c   : > { %691 = vrcp.f32 %v235_v24 }
  0x6d   : > { %693 = vrcp.f32 %v236_v25 }
  0x6e   : > { %695 = vlog2.f32 %v235_v24  ;;  %v387_v24 = vmul.f32 2.0, %v1047_v15 }
  0x6f   : > { %697 = vlog2.f32 %v236_v25 }
  0x70   : > { %699 = vpow2.f32 %v424_v9 }
  0x76   : > { %v692_v28 = vpop.eup %691 }
  0x77   : > { %v694_v29 = vpop.eup %693  ;;  %v241_v30 = vmul.f32 %v692_v28, %v688_v22 }
  0x78   : > { %v696_v33 = vpop.eup %695  ;;  %v242_v34 = vmul.f32 %v694_v29, %v690_v23 }
  0x79   : > { %v698_v37 = vpop.eup %697  ;;  %v243_v38 = vsel %vm239_vm4, %v692_v28, %v241_v30  ;;  %v248_v39 = vmul.f32 0.6931472, %v696_v33 }
  0x7a   : > { %v244_v40 = vsel %vm240_vm5, %v694_v29, %v242_v34  ;;  %v245_v41 = vsub.f32 1.0, %v243_v38  ;;  %v289_v42 = vmul.f32 %v582_v31, %v243_v38  ;;  %v250_v43 = vmul.f32 0.6931472, %v698_v37  ;;  %v700_v11 = vpop.eup %699 }
  0x7b   : > { %v246_v44 = vsub.f32 1.0, %v244_v40  ;;  %v290_v45 = vmul.f32 %v583_v35, %v244_v40  ;;  %v255_v46 = vadd.f32 %v253_v32, %v248_v39  ;;  %v428_v21 = vadd.f32 1.0, %v700_v11 }
  0x7c   : > { %v277_v47 = vmul.f32 %v1044_v14, %v245_v41  ;;  %v256_v48 = vadd.f32 %v254_v36, %v250_v43 }
  0x7d   : > { %v301_v50 = vadd.f32 %v246_v44, %v245_v41  ;;  %v278_v51 = vmul.f32 %v1047_v15, %v246_v44  ;;  %v291_v52 = vadd.f32 %v290_v45, %v289_v42  ;;  %v257_v53 = vsub.f32 0.0, %v255_v46 }
  0x7e   : > { %v258_v54 = vsub.f32 0.0, %v256_v48 }
  0x7f   : > { %302 = vadd.xlane.f32.xlu1 %v301_v50  ;;  %v279_v56 = vadd.f32 %v278_v51, %v277_v47  ;;  %v259_v57 = vsub.f32 %v257_v53, %v1036_v7  ;;  %v426_v7 = vmul.f32 1.442695, %v423_v4  ;;  %v415_v53 = vmax.f32 %v1033_v6, 0.0 }
  0x80   : > { %v260_v58 = vsub.f32 %v258_v54, %v1039_v8  ;;  %v351_v8 = vlaneseq }
  0x81   : > { %292 = vadd.xlane.f32.xlu0 %v291_v52  ;;  %v263_v59 = vadd.f32 %v261_v49, %v259_v57  ;;  %701 = vpow2.f32 %v426_v7  ;;  %v414_v52 = vmax.f32 %v1031_v5, 0.0 }
  0x82   : > { %v264_v60 = vadd.f32 %v262_v55, %v260_v58  ;;  %v352_v10 = vand.u32 127, %v351_v8  ;;  %v1069_v12 = vshrl.u32 %v351_v8, 7  ;;  %703 = vlog2.f32 %v428_v21 }
  0x83   : > { %280 = vadd.xlane.f32.xlu1 %v279_v56  ;;  %v265_v61 = vsub.f32 0.0, %v263_v59 }
  0x84   : > { %v266_v62 = vsub.f32 0.0, %v264_v60  ;;  %vm356_vm6 = vcmp.gt.s32.totalorder %v352_v10, 0  ;;  %vm359_vm7 = vcmp.lt.s32.totalorder %v352_v10, 127  ;;  %v355_v22 = vadd.s32 8, %v1069_v12 }
  0x85   : > { %v584_v17 = vsel %vm356_vm6, 1.0, %v849_v13  ;;  %v585_v28 = vsel %vm359_vm7, 1.0, %v849_v13  ;;  %vm362_vm8 = vcmp.gt.s32.totalorder %v1069_v12, 0  ;;  %vm394_vm10 = vcmp.lt.s32.totalorder %v1069_v12, 1 }
  0x86   : > { %v267_v63 = vadd.f32 %v266_v62, %v265_v61  ;;  %vm369_vm9 = vcmp.lt.s32.totalorder %v355_v22, 15  ;;  %vm401_vm11 = vcmp.lt.s32.totalorder %v1069_v12, 7  ;;  %v586_v14 = vsel %vm362_vm8, 1.0, %v849_v13 }
  0x87   : > { %v587_v37 = vsel %vm369_vm9, 1.0, %v849_v13  ;;  %vm446_vm14 = vcmp.eq.s32.totalorder %v1069_v12, 0  ;;  %vm449_vm15 = vcmp.eq.s32.totalorder %v1069_v12, 1  ;;  %vm453_vm0 = vcmp.eq.s32.totalorder %v1069_v12, 2 }
  0x88   : > { %268 = vadd.xlane.f32.xlu1 %v267_v63 }
  0x8b   : > { %v702_v16 = vpop.eup %701 }
  0x8c   : > { %323 = vadd.xlane.f32.xlu1 %v322_v0  ;;  %v429_v23 = vadd.f32 1.0, %v702_v16  ;;  %v704_v48 = vpop.eup %703 }
  0x8d   : > { %v431_v58 = vmul.f32 0.6931472, %v704_v48 }
  0x8e   : > { %705 = vlog2.f32 %v429_v23 }
  0x98   : > { %v706_v49 = vpop.eup %705 }
  0x99   : > { %v433_v59 = vmul.f32 0.6931472, %v706_v49 }
  0xd0   : > { %v679_v18 = vpop.permute.xlu0 %678 }
  0xd1   : > { %v681_v19 = vunpack.i.h.bf16 %v679_v18  ;;  %v680_v20 = vunpack.i.l.bf16 %v679_v18 }
  0xd3   : > { %v379_v25 = vmul.f32 %v681_v19, %v584_v17  ;;  %v378_v26 = vmul.f32 %v680_v20, %v584_v17 }
  0xd4   : > { %v684_v29 = vpop.permute.xlu0 %683 }
  0xd5   : > { %v686_v30 = vunpack.i.h.bf16 %v684_v29  ;;  %v685_v31 = vunpack.i.l.bf16 %v684_v29  ;;  %v389_v32 = vadd.f32 %v387_v24, %v379_v25  ;;  %v388_v33 = vadd.f32 %v386_v27, %v378_v26 }
  0xd7   : > { %v385_v34 = vmul.f32 %v686_v30, %v585_v28  ;;  %v384_v35 = vmul.f32 %v685_v31, %v585_v28 }
  0xd9   : > { %v390_v36 = vadd.f32 %v388_v33, %v384_v35  ;;  %v391_v15 = vadd.f32 %v389_v32, %v385_v34 }
  0xdb   : > { %v392_v38 = vrot.slane %v390_v36, 7  ;;  %v393_v39 = vrot.slane %v391_v15, 7  ;;  %v399_v40 = vrot.slane %v390_v36, 1  ;;  %v400_v41 = vrot.slane %v391_v15, 1 }
  0xdd   : > { %v396_v42 = vsel %vm394_vm10, %v393_v39, %v392_v38  ;;  %v403_v43 = vsel %vm401_vm11, %v400_v41, %v399_v40  ;;  %v395_v44 = vsel %vm394_vm10, %v392_v38, %v393_v39  ;;  %v402_v45 = vsel %vm401_vm11, %v399_v40, %v400_v41 }
  0xde   : > { %v397_v46 = vmul.f32 %v586_v14, %v396_v42  ;;  %v405_v47 = vmul.f32 %v587_v37, %v403_v43 }
  0xe0   : > { %v406_v50 = vsub.f32 %v402_v45, %v397_v46  ;;  %v407_v51 = vsub.f32 %v405_v47, %v395_v44 }
  0xe2   : > { %vm408_vm12 = vcmp.ne.f32.partialorder %v406_v50, 0.0  ;;  %vm409_vm13 = vcmp.ne.f32.partialorder %v407_v51, 0.0 }
  0xe3   : > { %v588_v54 = vsel %vm408_vm12, 1.0, %v849_v13  ;;  %v589_v55 = vsel %vm409_vm13, 1.0, %v849_v13 }
  0xe4   : > { %v416_v56 = vmul.f32 %v588_v54, %v1031_v5  ;;  %v417_v57 = vmul.f32 %v589_v55, %v1033_v6 }
  0xe6   : > { %v418_v60 = vsub.f32 %v414_v52, %v416_v56  ;;  %v419_v61 = vsub.f32 %v415_v53, %v417_v57 }
  0xe8   : > { %v434_v62 = vadd.f32 %v431_v58, %v418_v60  ;;  %v435_v63 = vadd.f32 %v433_v59, %v419_v61 }
  0xea   : > { %v436_v0 = vadd.f32 %v435_v63, %v434_v62 }
  0xeb   : > { %v314_v1 = vpop.xlane.xlu1 %313 }
  0xec   : > { %437 = vadd.xlane.f32.xlu1 %v436_v0  ;;  %v315_v4 = vrot.slane %v314_v1, 4 }
  0xee   : > { %v316_v11 = vadd.f32 %v315_v4, %v314_v1 }
  0xf0   : > { %v317_v20 = vrot.slane %v316_v11, 2 }
  0xf2   : > { %v318_v29 = vadd.f32 %v317_v20, %v316_v11 }
  0xf4   : > { %v319_v15 = vrot.slane %v318_v29, 1 }
  0xf6   : > { %v320_v41 = vadd.f32 %v319_v15, %v318_v29 }
 0x10c   : > { %v303_v2 = vpop.xlane.xlu1 %302 }
 0x10d   : > { %v304_v3 = vrot.slane %v303_v2, 4 }
 0x10e   : > { %v293_v9 = vpop.xlane.xlu0 %292 }
 0x10f   : > { %v294_v7 = vrot.slane %v293_v9, 4  ;;  %v305_v13 = vadd.f32 %v304_v3, %v303_v2 }
 0x110   : > { %v281_v8 = vpop.xlane.xlu1 %280 }
 0x111   : > { %v282_v10 = vrot.slane %v281_v8, 4  ;;  %v295_v5 = vadd.f32 %v294_v7, %v293_v9  ;;  %v306_v17 = vrot.slane %v305_v13, 2 }
 0x113   : > { %v283_v6 = vadd.f32 %v282_v10, %v281_v8  ;;  %v296_v16 = vrot.slane %v295_v5, 2  ;;  %v307_v26 = vadd.f32 %v306_v17, %v305_v13 }
 0x115   : > { %v284_v18 = vrot.slane %v283_v6, 2  ;;  %v269_v19 = vpop.xlane.xlu1 %268  ;;  %v297_v23 = vadd.f32 %v296_v16, %v295_v5  ;;  %v308_v34 = vrot.slane %v307_v26, 1 }
 0x116   : > { %v270_v21 = vrot.slane %v269_v19, 4 }
 0x117   : > { %v285_v22 = vadd.f32 %v284_v18, %v283_v6  ;;  %v298_v33 = vrot.slane %v297_v23, 1  ;;  %v309_v40 = vadd.f32 %v308_v34, %v307_v26 }
 0x118   : > { %v271_v24 = vadd.f32 %v270_v21, %v269_v19 }
 0x119   : > { %v324_v25 = vpop.xlane.xlu1 %323  ;;  %v286_v30 = vrot.slane %v285_v22, 1  ;;  %v299_v38 = vadd.f32 %v298_v33, %v297_v23 }
 0x11a   : > { %v272_v27 = vrot.slane %v271_v24, 2  ;;  %v325_v28 = vrot.slane %v324_v25, 4 }
 0x11b   : > { %v287_v14 = vadd.f32 %v286_v30, %v285_v22 }
 0x11c   : > { %v326_v31 = vadd.f32 %v325_v28, %v324_v25  ;;  %v273_v32 = vadd.f32 %v272_v27, %v271_v24 }
 0x11e   : > { %v327_v35 = vrot.slane %v326_v31, 2  ;;  %v274_v36 = vrot.slane %v273_v32, 1 }
 0x120   : > { %v275_v37 = vadd.f32 %v274_v36, %v273_v32  ;;  %v328_v39 = vadd.f32 %v327_v35, %v326_v31 }
 0x122   : > { %600 = vpush %v275_v37  ;;  %v329_v42 = vrot.slane %v328_v39, 1 }
 0x123   : > { %602 = vpush %v287_v14 }
 0x124   : > { %604 = vpush %v299_v38  ;;  %v330_v43 = vadd.f32 %v329_v42, %v328_v39 }
 0x125   : > { %606 = vpush %v309_v40 }
 0x126   : > { %608 = vpush %v320_v41 }
 0x127   : > { %610 = vpush %v330_v43 }
 0x153   : > { %s1087_s17 = spop %600 }
 0x154   : > { %s1089_s28 = spop %602  ;;  %v447_v55 = vstv %s1087_s17 }
 0x155   : > { %s1091_s25 = spop %604  ;;  %s332_s3 = smul.f32 2.0, %s1089_s28  ;;  %v448_v57 = vsel %vm446_vm14, %v447_v55, 0.0 }
 0x156   : > { %s607_s26 = spop %606  ;;  %s341_s5 = smul.f32 2.0, %s1091_s25 }
 0x157   : > { %s609_s27 = spop %608  ;;  %s311_s6 = ssub.f32 2048.0, %s607_s26 }
 0x158   : > { %s611_s29 = spop %610  ;;  %s334_s7 = sadd.f32 %s609_s27, %s607_s26 }
 0x159   : > { %s343_s14 = sadd.f32 %s611_s29, %s311_s6  ;;  %s577_s28 = sshll.u32 %s1017_s30, 3 }
 0x15a   : > { %s335_s16 = sadd.f32 1.0, %s334_s7  ;;  %s591_s25 = sshll.u32 %s890_s13, 7 }
 0x15b   : > { %s344_s4 = sadd.f32 1.0, %s343_s14  ;;  %s853_s13 = smov [#allocation7]  }
 0x15c   : > { %s336_s24 = smax.f32 %s852_s19, %s335_s16  ;;  %s333_s20 = sadd.f32 1.0, %s332_s3 }
 0x15d   : > { %v337_v44 = vstv %s336_s24  ;;  %s345_s23 = smax.f32 %s852_s19, %s344_s4  ;;  %s342_s8 = sadd.f32 1.0, %s341_s5 }
 0x15e   : > { %707 = vrcp.f32 %v337_v44  ;;  %v346_v45 = vstv %s345_s23  ;;  %s201_s16 = scalar_lea.vmem [#allocation7], %s577_s28  ;;  %s1104_s24 = scalar_lea.hbm %s1150_s2, %s591_s25 }
 0x15f   : > { %709 = vrcp.f32 %v346_v45  ;;  %s472_s4 = sshll.u32 %s201_s16, 4  ;;  %s459_s23 = scalar_lea.sflag [#allocation4], %s1017_s30  ;;  %s1106_s4 = int_to_ptr.vmem [resolvable:$true] %s472_s4 }
 0x160   : > { %s771_s3 = scalar_lea.vmem %s1106_s4, 128  ;;  %s775_s5 = sshll.u32 %s853_s13, 4  ;;  %s776_s5 = int_to_ptr.vmem [resolvable:$false] %s775_s5 }
 0x161   : > { %p772_p13 = scmp.ne.s32.totalorder %s1106_s4, %s771_s3  ;;  %p778_p5 = scmp.lt.s32.totalorder %s1106_s4, %s776_s5 }
 0x163   : > { %p773_p11 = pnand %p772_p13, %p1160_p1 }
 0x165   : > { %p774_p10 = pneg %p773_p11 }
 0x168   : > { %v708_v46 = vpop.eup %707 }
 0x169   : > { %v710_v47 = vpop.eup %709  ;;  %612 = vpush %v708_v46 }
 0x16a   : > { %614 = vpush %v710_v47 }
 0x179   : > { %v438_v48 = vpop.xlane.xlu1 %437 }
 0x17a   : > { %v439_v49 = vrot.slane %v438_v48, 4 }
 0x17c   : > { %v440_v50 = vadd.f32 %v439_v49, %v438_v48 }
 0x17e   : > { %v441_v51 = vrot.slane %v440_v50, 2 }
 0x180   : > { %v442_v52 = vadd.f32 %v441_v51, %v440_v50 }
 0x182   : > { %v443_v53 = vrot.slane %v442_v52, 1 }
 0x184   : > { %v444_v54 = vadd.f32 %v443_v53, %v442_v52 }
 0x186   : > { %616 = vpush %v444_v54 }
 0x19a   : > { %s613_s26 = spop %612 }
 0x19b   : > { %s340_s27 = smul.f32 %s613_s26, %s333_s20  ;;  %s615_s29 = spop %614 }
 0x19c   : > { %s349_s6 = smul.f32 %s615_s29, %s342_s8  ;;  %s777_s20 = scalar_lea.vmem %s776_s5, 256 }
 0x19d   : > { %p779_p7 = scmp.lt.s32.totalorder %s777_s20, %s771_s3 }
 0x19e   : > { %s350_s7 = sadd.f32 %s349_s6, %s340_s27 }
 0x19f   : > { %p780_p9 = por %p779_p7, %p778_p5 }
 0x1a0   : > { %v450_v56 = vstv %s350_s7 }
 0x1a1   : > { %v451_v58 = vsel %vm449_vm15, %v450_v56, 0.0  ;;  %p781_p3 = pnand %p780_p9, %p774_p10 }
 0x1a2   : > { %v452_v59 = vadd.f32 %v451_v58, %v448_v57 }
 0x1b7   : > { %s617_s14 = spop %616 }
 0x1b8   : > { %v454_v60 = vstv %s617_s14 }
 0x1b9   : > { %v455_v61 = vsel %vm453_vm0, %v454_v60, 0.0 }
 0x1ba   : > { %v456_v62 = vadd.f32 %v455_v61, %v452_v59 }
 0x1bc   : > { %457 = vst [vmem:[%s201_s16] sm:$0xff] %v456_v62 }
 0x1bd   : > { %784 = shalt.err (!%p781_p3)
}
 0x1be   : > { %s785_s30 = scalar_lea.hbm %s1104_s24, 128  ;;  %s789_s27 = scalar_lea.hbm %s1150_s2, 256 }
 0x1bf   : > { %p786_p12 = scmp.ne.s32.totalorder %s1104_s24, %s785_s30  ;;  %p790_p2 = scmp.lt.u32.totalorder %s1104_s24, %s1150_s2 }
 0x1c0   : > { %p791_p4 = scmp.lt.u32.totalorder %s789_s27, %s785_s30  ;;  %p793_p13 = scmp.lt.u32.totalorder %s785_s30, %s1104_s24 }
 0x1c1   : > { %p787_p8 = pnand %p786_p12, %p1160_p1 }
 0x1c2   : > { %p792_p6 = por %p791_p4, %p790_p2 }
 0x1c3   : > { %p788_p0 = pneg %p787_p8 }
 0x1c4   : > { %p794_p11 = por %p793_p13, %p792_p6 }
 0x1c6   : > { %p795_p10 = pnand %p794_p11, %p788_p0 }
 0x1c8   : > { %798 = shalt.err (!%p795_p10)
}
 0x1c9   : > { %622 = dma.vmem_to_hbm [thread:$0]  (%p1160_p1), %s1106_s4, 128, %s1104_s24, %s459_s23  }
 0x1ca PF: > { %s484_s7 = sand.u32 1, %s829_s9   ;;  %p1161_p5 = scmp.ne.s32.totalorder %s1156_s22, 0 }
 0x1cb   : > { %p1162_p7 = scmp.ge.s32.totalorder %s841_s12, 2  ;;  %s485_s28 = scalar_lea.sflag [#allocation4], %s484_s7 }
 0x1cd   : > { %p632_p9 = pnand %p1162_p7, %p1161_p5 }
 0x1cf   : > { %824 = dma.done.wait (!%p632_p9), %s485_s28, 128  }
 0x1d0   : > { %826 = vsyncadd (!%p632_p9), %s485_s28, 4294967168  ;;  %p18_p3 = scmp.ge.s32.totalorder %s894_s15, 4   ;;  %s1163_s9 = smov %s833_s10 }
 0x1d1   : > { %s1164_s10 = smov %s837_s11  ;;  %s1165_s11 = smov %s906_s18 }
 0x1d2   : > { %s1166_s12 = smov %s894_s15  ;;  %20 = sbr.rel (!%p18_p3) target bundleno = 7 (0x7), region = 87 }
 0x1d9   :  { %490 = vsyncpa [#allocation3], 1 }
 0x1da   :  { %492 = vsyncpa [#allocation3 + $0x1], 1 }
 0x1db   :  { %493 = vsyncpa [#allocation6], 1 }
 0x1dc   :  { %495 = vsyncpa [#allocation6 + $0x1], 1 }
 0x1dd   :  { %496 = vsyncpa [#allocation4], 1 }
 0x1de   :  { %498 = vsyncpa [#allocation4 + $0x1], 1 }

</bundles_post_ra>
